<compile_context>
chip_gen: v7x
topology: tpu7x:2x2x1
jax: 0.10.0
libtpu: 0.0.40
codegen_flags: <defaults>
</compile_context>

<pallas_src>
import functools

import jax
import jax.numpy as jnp
from jax.experimental import pallas as pl
from jax.experimental.pallas import tpu as pltpu


def _round_up(v, m):
    return (v + m - 1) // m * m


def _pick_row_tile(H, Wq):
    """Rows of output per grid step: aim for a healthy, lane-dense MXU N tile."""
    best_key, best_ht = None, 1
    for h_t in range(1, H + 1):
        lanes = h_t * Wq
        if lanes > 4096 and best_key is not None:
            break
        n_tiles = -(-H // h_t)
        key = (
            lanes % 128 == 0,        # lane-dense stores (unmasked vst)
            H % h_t == 0,            # no wasted padded rows
            n_tiles >= 2,            # >=2 row tiles -> pipeline / megacore overlap
            512 <= lanes <= 2048,    # good MXU N tile, amortizes ~0.35us/step
            -abs(lanes - 1024),
        )
        if best_key is None or key > best_key:
            best_key, best_ht = key, h_t
    return best_ht


def _vmem_limit(need_bytes):
    cap = 64 * 1024 * 1024                       # v7x floor
    try:
        info = pltpu.get_tpu_info()
        cap = int(getattr(info, "vmem_capacity_bytes", cap))
    except Exception:
        pass
    return int(max(32 << 20, min(need_bytes + (8 << 20), int(cap * 0.9))))


# ----------------------------------------------------------------------------
# Pallas kernel: modulated conv (Conv2DMod) + demod + fused noise/add + lrelu
# ----------------------------------------------------------------------------
def _modconv_kernel(x_ref, w_ref, m_ref, *rest, k, wq, t_out,
                    demod, has_noise, has_add, act, neg_slope):
    # x_ref:     (1, 1, cin_p, T_in)  bf16  row tile with inline halo lanes
    # w_ref:     (kk, o_p, cin_p)     bf16  batch-invariant weights (tap-major)
    # m_ref:     (1, cin_p, 1)        bf16  per-batch (style + 1)
    # d_ref:     (1, o_p, 1)          f32   per-batch demod factors   [if demod]
    # noise_ref: (1, 1, 1, T_out)     f32   1-channel noise row tile  [if noise]
    # nw/nb_ref: (o_p, 1)             f32   noise Linear(1,F) w / b   [if noise]
    # add_ref:   (1, 1, o_p, T_out)   f32   prev_rgb row tile         [if add]
    # o_ref:     (1, 1, o_p, T_out)   f32
    # xm_scr:    (cin_p, T_in)        bf16  modulated-activation window
    idx = 0
    d_ref = None
    if demod:
        d_ref = rest[idx]
        idx += 1
    noise_ref = nw_ref = nb_ref = None
    if has_noise:
        noise_ref, nw_ref, nb_ref = rest[idx:idx + 3]
        idx += 3
    add_ref = None
    if has_add:
        add_ref = rest[idx]
        idx += 1
    o_ref = rest[idx]
    idx += 1
    xm_scr = rest[idx]

    # Modulate the activations once per tile (bf16) -- equivalent to w*(style+1).
    xm_scr[...] = x_ref[0, 0] * m_ref[0]

    # k*k accumulating MXU matmuls over contiguous lane windows (no big im2col).
    kk = k * k
    acc = None
    for j in range(kk):
        off = (j // k) * wq + (j % k)
        part = jnp.dot(w_ref[j], xm_scr[:, off:off + t_out],
                       preferred_element_type=jnp.float32)
        acc = part if acc is None else acc + part

    if demod:
        acc = acc * d_ref[0]                                   # per-out-channel scale
    if has_noise:
        acc = acc + (noise_ref[0, 0] * nw_ref[...] + nb_ref[...])
    if has_add:
        acc = acc + add_ref[0, 0]
    if act:
        acc = jnp.where(acc >= 0.0, acc, neg_slope * acc)      # LeakyReLU(0.2)
    o_ref[0, 0] = acc


def modulated_conv2d(x, style, weight, *, noise_map=None, noise_w=None,
                     noise_b=None, add=None, demod=True, act=False,
                     eps=1e-8, neg_slope=0.2):
    """Conv2DMod forward (stride=1, dilation=1, 'same' padding) via Pallas."""
    B, Cin, H, W = x.shape
    O, Cw, k, _ = weight.shape
    assert Cw == Cin
    pad = (k - 1) // 2
    Wq = W + 2 * pad                     # row pitch (cols >= W are garbage)
    kk = k * k
    cin_p = _round_up(Cin, 16)           # bf16 packs 2 rows/sublane
    o_p = _round_up(O, 8)

    # Row tiling with inline halo, lane-dense pitches.
    h_t = _pick_row_tile(H, Wq)
    R = pl.cdiv(H, h_t)
    H_pad = R * h_t
    hW = h_t * Wq                        # real output lanes per row tile
    halo = (k - 1) * (Wq + 1)            # extra lanes a tile's taps may read
    T_out = _round_up(hW, 128)
    T_in = T_out + (_round_up(halo, 128) if halo else 0)
    win = hW + halo

    # ---- padded input, flattened & re-tiled with inline halo (bf16) ---------
    xp = jnp.pad(x.astype(jnp.bfloat16),
                 ((0, 0), (0, cin_p - Cin),
                  (pad, pad + (H_pad - H)), (pad, pad)))
    xf = xp.reshape(B, cin_p, (H_pad + 2 * pad) * Wq)
    if k > 1:
        xf = jnp.pad(xf, ((0, 0), (0, 0), (0, k - 1)))
    x_tiles = jnp.stack(
        [jax.lax.slice_in_dim(xf, r * hW, r * hW + win, axis=2)
         for r in range(R)], axis=1)                       # (B, R, cin_p, win)
    x_tiles = jnp.pad(x_tiles, ((0, 0), (0, 0), (0, 0), (0, T_in - win)))

    # ---- batch-invariant bf16 weights, tap-major: (kk, o_p, cin_p) ----------
    w3 = jnp.transpose(weight, (2, 3, 0, 1))               # (k, k, O, Cin)
    w3 = jnp.pad(w3, ((0, 0), (0, 0), (0, o_p - O), (0, cin_p - Cin)))
    w3 = w3.reshape(kk, o_p, cin_p).astype(jnp.bfloat16)

    # ---- per-batch modulation (on activations) + precomputed demod ----------
    s1 = style.astype(jnp.float32) + 1.0                   # (B, Cin)
    m_col = jnp.pad(s1, ((0, 0), (0, cin_p - Cin)))[:, :, None].astype(jnp.bfloat16)

    inputs = [x_tiles, w3, m_col]
    in_specs = [
        pl.BlockSpec((1, 1, cin_p, T_in), lambda b, r: (b, r, 0, 0)),
        pl.BlockSpec((kk, o_p, cin_p), lambda b, r: (0, 0, 0)),
        pl.BlockSpec((1, cin_p, 1), lambda b, r: (b, 0, 0)),
    ]

    if demod:
        wsq = jnp.sum(weight.astype(jnp.float32) ** 2, axis=(2, 3))  # (O, Cin)
        d = jax.lax.rsqrt(wsq @ (s1 * s1).T + eps)                   # (O, B)
        d = jnp.pad(d.T, ((0, 0), (0, o_p - O)), constant_values=1.0)[:, :, None]
        inputs.append(d)
        in_specs.append(pl.BlockSpec((1, o_p, 1), lambda b, r: (b, 0, 0)))

    has_noise = noise_map is not None
    if has_noise:
        nf = jnp.pad(noise_map.astype(jnp.float32),
                     ((0, 0), (0, H_pad - H), (0, 2 * pad)))          # (B, H_pad, Wq)
        nf = nf.reshape(B, H_pad * Wq)
        n_tiles = jnp.stack(
            [jax.lax.slice_in_dim(nf, r * hW, (r + 1) * hW, axis=1)
             for r in range(R)], axis=1)                              # (B, R, hW)
        n_tiles = jnp.pad(n_tiles, ((0, 0), (0, 0), (0, T_out - hW)))[:, :, None, :]
        nw = jnp.pad(noise_w.astype(jnp.float32).reshape(-1), (0, o_p - O))[:, None]
        nb = jnp.pad(noise_b.astype(jnp.float32).reshape(-1), (0, o_p - O))[:, None]
        inputs += [n_tiles, nw, nb]
        in_specs += [
            pl.BlockSpec((1, 1, 1, T_out), lambda b, r: (b, r, 0, 0)),
            pl.BlockSpec((o_p, 1), lambda b, r: (0, 0)),
            pl.BlockSpec((o_p, 1), lambda b, r: (0, 0)),
        ]

    has_add = add is not None
    if has_add:
        assert add.shape[1] == O and add.shape[2:] == (H, W)
        af = jnp.pad(add.astype(jnp.float32),
                     ((0, 0), (0, o_p - O), (0, H_pad - H), (0, 2 * pad)))
        af = af.reshape(B, o_p, H_pad * Wq)
        a_tiles = jnp.stack(
            [jax.lax.slice_in_dim(af, r * hW, (r + 1) * hW, axis=2)
             for r in range(R)], axis=1)                              # (B, R, o_p, hW)
        a_tiles = jnp.pad(a_tiles, ((0, 0), (0, 0), (0, 0), (0, T_out - hW)))
        inputs.append(a_tiles)
        in_specs.append(pl.BlockSpec((1, 1, o_p, T_out), lambda b, r: (b, r, 0, 0)))

    kernel = functools.partial(
        _modconv_kernel, k=k, wq=Wq, t_out=T_out, demod=demod,
        has_noise=has_noise, has_add=has_add, act=act, neg_slope=neg_slope)

    # Per-step VMEM footprint (double-buffered blocks + scratch) -> limit.
    bytes_per_step = (
        2 * cin_p * T_in * 2            # x row tile (bf16)
        + 2 * kk * o_p * cin_p * 2      # weights (bf16, resident)
        + 2 * o_p * T_out * 4           # output tile (f32)
        + cin_p * T_in * 2              # modulated-window scratch (bf16)
        + 2 * (cin_p + 4 * o_p) * 128 * 4   # m/d/nw/nb vectors (lane-padded)
    )
    if has_noise:
        bytes_per_step += 2 * 8 * T_out * 4
    if has_add:
        bytes_per_step += 2 * o_p * T_out * 4

    out = pl.pallas_call(
        kernel,
        out_shape=jax.ShapeDtypeStruct((B, R, o_p, T_out), jnp.float32),
        grid_spec=pltpu.PrefetchScalarGridSpec(
            num_scalar_prefetch=0,
            grid=(B, R),
            in_specs=in_specs,
            out_specs=pl.BlockSpec((1, 1, o_p, T_out), lambda b, r: (b, r, 0, 0)),
            scratch_shapes=[pltpu.VMEM((cin_p, T_in), jnp.bfloat16)],
        ),
        compiler_params=pltpu.CompilerParams(
            dimension_semantics=("parallel", "parallel"),
            vmem_limit_bytes=_vmem_limit(bytes_per_step)),
    )(*inputs)

    # (B, R, o_p, T_out) -> (B, O, H, W): drop padded lanes / rows / channels.
    out = jnp.transpose(out[..., :hW], (0, 2, 1, 3)).reshape(B, o_p, H_pad, Wq)
    return out[:, :O, :H, :W]


# ----------------------------------------------------------------------------
# Plain-JAX glue: bilinear 2x upsample (align_corners=False) and 3x3 blur
# ----------------------------------------------------------------------------
def _up2x_1d_last(x):
    # out[2i] = 0.25*x[i-1] + 0.75*x[i]; out[2i+1] = 0.75*x[i] + 0.25*x[i+1]
    n = x.shape[-1]
    xm = jnp.concatenate([x[..., :1], x[..., :-1]], axis=-1)
    xp = jnp.concatenate([x[..., 1:], x[..., -1:]], axis=-1)
    even = 0.25 * xm + 0.75 * x
    odd = 0.75 * x + 0.25 * xp
    out = jnp.stack([even, odd], axis=-1)
    return out.reshape(x.shape[:-1] + (2 * n,))


def upsample_bilinear_2x(x):
    # nn.Upsample(scale_factor=2, mode='bilinear', align_corners=False)
    xT = jnp.swapaxes(x, 2, 3)
    xT = _up2x_1d_last(xT)                 # upsample H
    x = jnp.swapaxes(xT, 2, 3)
    return _up2x_1d_last(x)                # upsample W


def blur3x3(x):
    # kornia.filter2d with [1,2,1]x[1,2,1], normalized=True, reflect padding
    f = jnp.array([1.0, 2.0, 1.0], jnp.float32)
    kmat = f[:, None] * f[None, :]
    kmat = kmat / jnp.sum(kmat)
    b, c, h, w = x.shape
    xp = jnp.pad(x, ((0, 0), (0, 0), (1, 1), (1, 1)), mode="reflect")
    out = jnp.zeros_like(x)
    for i in range(3):
        for j in range(3):
            out = out + kmat[i, j] * xp[:, :, i:i + h, j:j + w]
    return out


# ----------------------------------------------------------------------------
# GeneratorBlock parameters + forward
# ----------------------------------------------------------------------------
def init_generator_block(key, latent_dim, input_channels, filters, rgba=False):
    ks = jax.random.split(key, 8)

    def kaiming_conv(k, out_c, in_c, ksz):
        std = (2.0 / (in_c * ksz * ksz)) ** 0.5
        return jax.random.normal(k, (out_c, in_c, ksz, ksz), jnp.float32) * std

    def linear(k, out_f, in_f):
        kw, kb = jax.random.split(k)
        bound = 1.0 / (in_f ** 0.5)
        w = jax.random.uniform(kw, (out_f, in_f), jnp.float32, -bound, bound)
        b = jax.random.uniform(kb, (out_f,), jnp.float32, -bound, bound)
        return w, b

    out_rgb = 4 if rgba else 3
    return dict(
        to_style1=linear(ks[0], input_channels, latent_dim),
        to_noise1=linear(ks[1], filters, 1),
        conv1_w=kaiming_conv(ks[2], filters, input_channels, 3),
        to_style2=linear(ks[3], filters, latent_dim),
        to_noise2=linear(ks[4], filters, 1),
        conv2_w=kaiming_conv(ks[5], filters, filters, 3),
        rgb_to_style=linear(ks[6], filters, latent_dim),
        rgb_conv_w=kaiming_conv(ks[7], out_rgb, filters, 1),
    )


def generator_block_forward(params, x, prev_rgb, istyle, inoise, *,
                            upsample=True, upsample_rgb=True):
    if upsample:
        x = upsample_bilinear_2x(x)
    B, Cin, H, W = x.shape
    assert H == W  # the (0,3,2,1) permute in the reference requires square maps

    # Transposed noise map: add[b, f, i, j] = inoise[b, j, i, 0] * wn[f] + bn[f]
    noise_map = jnp.transpose(inoise[:, :H, :W, 0], (0, 2, 1))   # (B, H, W)
    wn1, bn1 = params["to_noise1"]
    wn2, bn2 = params["to_noise2"]

    ws1, bs1 = params["to_style1"]
    style1 = istyle @ ws1.T + bs1                                # (B, Cin)
    x = modulated_conv2d(x, style1, params["conv1_w"],
                         noise_map=noise_map, noise_w=wn1, noise_b=bn1,
                         demod=True, act=True)                   # conv1 + noise + lrelu

    ws2, bs2 = params["to_style2"]
    style2 = istyle @ ws2.T + bs2                                # (B, F)
    style_coords = jnp.concatenate([style1, style2], axis=-1)

    x = modulated_conv2d(x, style2, params["conv2_w"],
                         noise_map=noise_map, noise_w=wn2, noise_b=bn2,
                         demod=True, act=True)                   # conv2 + noise + lrelu

    wsr, bsr = params["rgb_to_style"]
    style_rgb = istyle @ wsr.T + bsr                             # (B, F)
    rgb = modulated_conv2d(x, style_rgb, params["rgb_conv_w"], add=prev_rgb,
                           demod=False, act=False)               # 1x1 mod-conv + prev_rgb
    if upsample_rgb:
        rgb = blur3x3(upsample_bilinear_2x(rgb))
    return x, rgb, style_coords


# ----------------------------------------------------------------------------
if __name__ == "__main__":
    latent_dim, input_channels, filters = 32, 4, 8
    B, H0, W0 = 2, 8, 8

    key = jax.random.PRNGKey(0)
    k_p, k_x, k_s, k_n, k_r = jax.random.split(key, 5)
    params = init_generator_block(k_p, latent_dim, input_channels, filters)

    x = jax.random.normal(k_x, (B, input_channels, H0, W0), jnp.float32)
    istyle = jax.random.normal(k_s, (B, latent_dim), jnp.float32)
    inoise = jax.random.uniform(k_n, (B, 4 * H0, 4 * W0, 1), jnp.float32)
    prev_rgb = jax.random.normal(k_r, (B, 3, 2 * H0, 2 * W0), jnp.float32)

    fwd = jax.jit(functools.partial(generator_block_forward,
                                    upsample=True, upsample_rgb=True))
    x_out, rgb, style_coords = fwd(params, x, prev_rgb, istyle, inoise)
    jax.block_until_ready((x_out, rgb, style_coords))

    assert x_out.shape == (B, filters, 2 * H0, 2 * W0)
    assert rgb.shape == (B, 3, 4 * H0, 4 * W0)
    assert style_coords.shape == (B, input_channels + filters)
    print("KERNEL_OK")
</pallas_src>

<mosaic_0001>
module attributes {stable_mosaic.version = 11 : i64} {
  func.func @_modconv_kernel(%arg0: i32, %arg1: i32, %arg2: memref<1x1x16x384xbf16, #tpu.memory_space<vmem>>, %arg3: memref<9x8x16xbf16, #tpu.memory_space<vmem>>, %arg4: memref<1x16x1xbf16, #tpu.memory_space<vmem>>, %arg5: memref<1x8x1xf32, #tpu.memory_space<vmem>>, %arg6: memref<1x1x1x256xf32, #tpu.memory_space<vmem>>, %arg7: memref<8x1xf32, #tpu.memory_space<vmem>>, %arg8: memref<8x1xf32, #tpu.memory_space<vmem>>, %arg9: memref<1x1x8x256xf32, #tpu.memory_space<vmem>>, %arg10: memref<16x384xbf16, #tpu.memory_space<vmem>>) attributes {dimension_semantics = [#tpu.dimension_semantics<parallel>, #tpu.dimension_semantics<parallel>], iteration_bounds = array<i64: 2, 2>, scalar_prefetch = 0 : i64, scratch_operands = 1 : i64, tpu.core_type = #tpu.core_type<tc>, window_params = [{transform_indices = @transform_0, window_bounds = array<i64: 1, 1, 16, 384>}, {pipeline_mode = #tpu.pipeline_mode<synchronous>, transform_indices = @transform_1, window_bounds = array<i64: 9, 8, 16>}, {transform_indices = @transform_2, window_bounds = array<i64: 1, 16, 1>}, {transform_indices = @transform_3, window_bounds = array<i64: 1, 8, 1>}, {transform_indices = @transform_4, window_bounds = array<i64: 1, 1, 1, 256>}, {pipeline_mode = #tpu.pipeline_mode<synchronous>, transform_indices = @transform_5, window_bounds = array<i64: 8, 1>}, {pipeline_mode = #tpu.pipeline_mode<synchronous>, transform_indices = @transform_6, window_bounds = array<i64: 8, 1>}, {transform_indices = @transform_7, window_bounds = array<i64: 1, 1, 8, 256>}]} {
    %c0 = arith.constant 0 : index
    %c0_0 = arith.constant 0 : index
    %c0_1 = arith.constant 0 : index
    %c0_2 = arith.constant 0 : index
    %0 = vector.load %arg2[%c0, %c0_0, %c0_1, %c0_2] : memref<1x1x16x384xbf16, #tpu.memory_space<vmem>>, vector<1x1x16x384xbf16>
    %1 = vector.shape_cast %0 : vector<1x1x16x384xbf16> to vector<16x384xbf16>
    %c0_3 = arith.constant 0 : index
    %c0_4 = arith.constant 0 : index
    %c0_5 = arith.constant 0 : index
    %2 = vector.load %arg4[%c0_3, %c0_4, %c0_5] : memref<1x16x1xbf16, #tpu.memory_space<vmem>>, vector<1x16x1xbf16>
    %3 = vector.shape_cast %2 : vector<1x16x1xbf16> to vector<16x1xbf16>
    %4 = vector.broadcast %3 : vector<16x1xbf16> to vector<16x384xbf16>
    %5 = arith.mulf %1, %4 : vector<16x384xbf16>
    %c0_6 = arith.constant 0 : index
    %c0_7 = arith.constant 0 : index
    %6 = vector.load %arg10[%c0_6, %c0_7] : memref<16x384xbf16, #tpu.memory_space<vmem>>, vector<16x384xbf16>
    tpu.vector_store %arg10[%c0_6, %c0_7], %5 {strides = array<i32>} : memref<16x384xbf16, #tpu.memory_space<vmem>>, vector<16x384xbf16>,
    %c0_8 = arith.constant 0 : index
    %c0_9 = arith.constant 0 : index
    %c0_10 = arith.constant 0 : index
    %7 = vector.load %arg3[%c0_8, %c0_9, %c0_10] : memref<9x8x16xbf16, #tpu.memory_space<vmem>>, vector<1x8x16xbf16>
    %8 = vector.shape_cast %7 : vector<1x8x16xbf16> to vector<8x16xbf16>
    %c0_11 = arith.constant 0 : index
    %c0_12 = arith.constant 0 : index
    %9 = vector.load %arg10[%c0_11, %c0_12] : memref<16x384xbf16, #tpu.memory_space<vmem>>, vector<16x256xbf16>
    %cst = arith.constant dense<0.000000e+00> : vector<8x256xf32>
    %10 = tpu.matmul %8, %9, %cst {dimension_numbers = #tpu.dot_dimension_numbers<[1], [0], [0], [1], [0, 0, 1, 1], [], []>} : vector<8x16xbf16>, vector<16x256xbf16>, vector<8x256xf32> -> vector<8x256xf32>
    %c1 = arith.constant 1 : index
    %c0_13 = arith.constant 0 : index
    %c0_14 = arith.constant 0 : index
    %11 = vector.load %arg3[%c1, %c0_13, %c0_14] : memref<9x8x16xbf16, #tpu.memory_space<vmem>>, vector<1x8x16xbf16>
    %12 = vector.shape_cast %11 : vector<1x8x16xbf16> to vector<8x16xbf16>
    %c0_15 = arith.constant 0 : index
    %c1_16 = arith.constant 1 : index
    %13 = vector.load %arg10[%c0_15, %c1_16] : memref<16x384xbf16, #tpu.memory_space<vmem>>, vector<16x256xbf16>
    %cst_17 = arith.constant dense<0.000000e+00> : vector<8x256xf32>
    %14 = tpu.matmul %12, %13, %cst_17 {dimension_numbers = #tpu.dot_dimension_numbers<[1], [0], [0], [1], [0, 0, 1, 1], [], []>} : vector<8x16xbf16>, vector<16x256xbf16>, vector<8x256xf32> -> vector<8x256xf32>
    %15 = arith.addf %10, %14 : vector<8x256xf32>
    %c2 = arith.constant 2 : index
    %c0_18 = arith.constant 0 : index
    %c0_19 = arith.constant 0 : index
    %16 = vector.load %arg3[%c2, %c0_18, %c0_19] : memref<9x8x16xbf16, #tpu.memory_space<vmem>>, vector<1x8x16xbf16>
    %17 = vector.shape_cast %16 : vector<1x8x16xbf16> to vector<8x16xbf16>
    %c0_20 = arith.constant 0 : index
    %c2_21 = arith.constant 2 : index
    %18 = vector.load %arg10[%c0_20, %c2_21] : memref<16x384xbf16, #tpu.memory_space<vmem>>, vector<16x256xbf16>
    %cst_22 = arith.constant dense<0.000000e+00> : vector<8x256xf32>
    %19 = tpu.matmul %17, %18, %cst_22 {dimension_numbers = #tpu.dot_dimension_numbers<[1], [0], [0], [1], [0, 0, 1, 1], [], []>} : vector<8x16xbf16>, vector<16x256xbf16>, vector<8x256xf32> -> vector<8x256xf32>
    %20 = arith.addf %15, %19 : vector<8x256xf32>
    %c3 = arith.constant 3 : index
    %c0_23 = arith.constant 0 : index
    %c0_24 = arith.constant 0 : index
    %21 = vector.load %arg3[%c3, %c0_23, %c0_24] : memref<9x8x16xbf16, #tpu.memory_space<vmem>>, vector<1x8x16xbf16>
    %22 = vector.shape_cast %21 : vector<1x8x16xbf16> to vector<8x16xbf16>
    %c0_25 = arith.constant 0 : index
    %c18 = arith.constant 18 : index
    %23 = vector.load %arg10[%c0_25, %c18] : memref<16x384xbf16, #tpu.memory_space<vmem>>, vector<16x256xbf16>
    %cst_26 = arith.constant dense<0.000000e+00> : vector<8x256xf32>
    %24 = tpu.matmul %22, %23, %cst_26 {dimension_numbers = #tpu.dot_dimension_numbers<[1], [0], [0], [1], [0, 0, 1, 1], [], []>} : vector<8x16xbf16>, vector<16x256xbf16>, vector<8x256xf32> -> vector<8x256xf32>
    %25 = arith.addf %20, %24 : vector<8x256xf32>
    %c4 = arith.constant 4 : index
    %c0_27 = arith.constant 0 : index
    %c0_28 = arith.constant 0 : index
    %26 = vector.load %arg3[%c4, %c0_27, %c0_28] : memref<9x8x16xbf16, #tpu.memory_space<vmem>>, vector<1x8x16xbf16>
    %27 = vector.shape_cast %26 : vector<1x8x16xbf16> to vector<8x16xbf16>
    %c0_29 = arith.constant 0 : index
    %c19 = arith.constant 19 : index
    %28 = vector.load %arg10[%c0_29, %c19] : memref<16x384xbf16, #tpu.memory_space<vmem>>, vector<16x256xbf16>
    %cst_30 = arith.constant dense<0.000000e+00> : vector<8x256xf32>
    %29 = tpu.matmul %27, %28, %cst_30 {dimension_numbers = #tpu.dot_dimension_numbers<[1], [0], [0], [1], [0, 0, 1, 1], [], []>} : vector<8x16xbf16>, vector<16x256xbf16>, vector<8x256xf32> -> vector<8x256xf32>
    %30 = arith.addf %25, %29 : vector<8x256xf32>
    %c5 = arith.constant 5 : index
    %c0_31 = arith.constant 0 : index
    %c0_32 = arith.constant 0 : index
    %31 = vector.load %arg3[%c5, %c0_31, %c0_32] : memref<9x8x16xbf16, #tpu.memory_space<vmem>>, vector<1x8x16xbf16>
    %32 = vector.shape_cast %31 : vector<1x8x16xbf16> to vector<8x16xbf16>
    %c0_33 = arith.constant 0 : index
    %c20 = arith.constant 20 : index
    %33 = vector.load %arg10[%c0_33, %c20] : memref<16x384xbf16, #tpu.memory_space<vmem>>, vector<16x256xbf16>
    %cst_34 = arith.constant dense<0.000000e+00> : vector<8x256xf32>
    %34 = tpu.matmul %32, %33, %cst_34 {dimension_numbers = #tpu.dot_dimension_numbers<[1], [0], [0], [1], [0, 0, 1, 1], [], []>} : vector<8x16xbf16>, vector<16x256xbf16>, vector<8x256xf32> -> vector<8x256xf32>
    %35 = arith.addf %30, %34 : vector<8x256xf32>
    %c6 = arith.constant 6 : index
    %c0_35 = arith.constant 0 : index
    %c0_36 = arith.constant 0 : index
    %36 = vector.load %arg3[%c6, %c0_35, %c0_36] : memref<9x8x16xbf16, #tpu.memory_space<vmem>>, vector<1x8x16xbf16>
    %37 = vector.shape_cast %36 : vector<1x8x16xbf16> to vector<8x16xbf16>
    %c0_37 = arith.constant 0 : index
    %c36 = arith.constant 36 : index
    %38 = vector.load %arg10[%c0_37, %c36] : memref<16x384xbf16, #tpu.memory_space<vmem>>, vector<16x256xbf16>
    %cst_38 = arith.constant dense<0.000000e+00> : vector<8x256xf32>
    %39 = tpu.matmul %37, %38, %cst_38 {dimension_numbers = #tpu.dot_dimension_numbers<[1], [0], [0], [1], [0, 0, 1, 1], [], []>} : vector<8x16xbf16>, vector<16x256xbf16>, vector<8x256xf32> -> vector<8x256xf32>
    %40 = arith.addf %35, %39 : vector<8x256xf32>
    %c7 = arith.constant 7 : index
    %c0_39 = arith.constant 0 : index
    %c0_40 = arith.constant 0 : index
    %41 = vector.load %arg3[%c7, %c0_39, %c0_40] : memref<9x8x16xbf16, #tpu.memory_space<vmem>>, vector<1x8x16xbf16>
    %42 = vector.shape_cast %41 : vector<1x8x16xbf16> to vector<8x16xbf16>
    %c0_41 = arith.constant 0 : index
    %c37 = arith.constant 37 : index
    %43 = vector.load %arg10[%c0_41, %c37] : memref<16x384xbf16, #tpu.memory_space<vmem>>, vector<16x256xbf16>
    %cst_42 = arith.constant dense<0.000000e+00> : vector<8x256xf32>
    %44 = tpu.matmul %42, %43, %cst_42 {dimension_numbers = #tpu.dot_dimension_numbers<[1], [0], [0], [1], [0, 0, 1, 1], [], []>} : vector<8x16xbf16>, vector<16x256xbf16>, vector<8x256xf32> -> vector<8x256xf32>
    %45 = arith.addf %40, %44 : vector<8x256xf32>
    %c8 = arith.constant 8 : index
    %c0_43 = arith.constant 0 : index
    %c0_44 = arith.constant 0 : index
    %46 = vector.load %arg3[%c8, %c0_43, %c0_44] : memref<9x8x16xbf16, #tpu.memory_space<vmem>>, vector<1x8x16xbf16>
    %47 = vector.shape_cast %46 : vector<1x8x16xbf16> to vector<8x16xbf16>
    %c0_45 = arith.constant 0 : index
    %c38 = arith.constant 38 : index
    %48 = vector.load %arg10[%c0_45, %c38] : memref<16x384xbf16, #tpu.memory_space<vmem>>, vector<16x256xbf16>
    %cst_46 = arith.constant dense<0.000000e+00> : vector<8x256xf32>
    %49 = tpu.matmul %47, %48, %cst_46 {dimension_numbers = #tpu.dot_dimension_numbers<[1], [0], [0], [1], [0, 0, 1, 1], [], []>} : vector<8x16xbf16>, vector<16x256xbf16>, vector<8x256xf32> -> vector<8x256xf32>
    %50 = arith.addf %45, %49 : vector<8x256xf32>
    %c0_47 = arith.constant 0 : index
    %c0_48 = arith.constant 0 : index
    %c0_49 = arith.constant 0 : index
    %51 = vector.load %arg5[%c0_47, %c0_48, %c0_49] : memref<1x8x1xf32, #tpu.memory_space<vmem>>, vector<1x8x1xf32>
    %52 = vector.shape_cast %51 : vector<1x8x1xf32> to vector<8x1xf32>
    %53 = vector.broadcast %52 : vector<8x1xf32> to vector<8x256xf32>
    %54 = arith.mulf %50, %53 : vector<8x256xf32>
    %c0_50 = arith.constant 0 : index
    %c0_51 = arith.constant 0 : index
    %c0_52 = arith.constant 0 : index
    %c0_53 = arith.constant 0 : index
    %55 = vector.load %arg6[%c0_50, %c0_51, %c0_52, %c0_53] : memref<1x1x1x256xf32, #tpu.memory_space<vmem>>, vector<1x1x1x256xf32>
    %56 = vector.shape_cast %55 : vector<1x1x1x256xf32> to vector<1x256xf32>
    %c0_54 = arith.constant 0 : index
    %c0_55 = arith.constant 0 : index
    %57 = vector.load %arg7[%c0_54, %c0_55] : memref<8x1xf32, #tpu.memory_space<vmem>>, vector<8x1xf32>
    %58 = vector.broadcast %56 : vector<1x256xf32> to vector<8x256xf32>
    %59 = vector.broadcast %57 : vector<8x1xf32> to vector<8x256xf32>
    %60 = arith.mulf %58, %59 : vector<8x256xf32>
    %c0_56 = arith.constant 0 : index
    %c0_57 = arith.constant 0 : index
    %61 = vector.load %arg8[%c0_56, %c0_57] : memref<8x1xf32, #tpu.memory_space<vmem>>, vector<8x1xf32>
    %62 = vector.broadcast %61 : vector<8x1xf32> to vector<8x256xf32>
    %63 = arith.addf %60, %62 : vector<8x256xf32>
    %64 = arith.addf %54, %63 : vector<8x256xf32>
    %cst_58 = arith.constant 0.000000e+00 : f32
    %65 = vector.broadcast %cst_58 : f32 to vector<8x256xf32>
    %66 = arith.cmpf oge, %64, %65 : vector<8x256xf32>
    %cst_59 = arith.constant 2.000000e-01 : f32
    %67 = vector.broadcast %cst_59 : f32 to vector<8x256xf32>
    %68 = arith.mulf %67, %64 : vector<8x256xf32>
    %69 = arith.select %66, %64, %68 : vector<8x256xi1>, vector<8x256xf32>
    %c0_60 = arith.constant 0 : index
    %c0_61 = arith.constant 0 : index
    %c0_62 = arith.constant 0 : index
    %c0_63 = arith.constant 0 : index
    %70 = vector.load %arg9[%c0_60, %c0_61, %c0_62, %c0_63] : memref<1x1x8x256xf32, #tpu.memory_space<vmem>>, vector<1x1x8x256xf32>
    %71 = vector.shape_cast %70 : vector<1x1x8x256xf32> to vector<8x256xf32>
    %72 = vector.shape_cast %69 : vector<8x256xf32> to vector<1x1x8x256xf32>
    tpu.vector_store %arg9[%c0_60, %c0_61, %c0_62, %c0_63], %72 {strides = array<i32>} : memref<1x1x8x256xf32, #tpu.memory_space<vmem>>, vector<1x1x8x256xf32>,
    return
  }
  func.func @transform_0(%arg0: i32, %arg1: i32) -> (i32, i32, i32, i32) {
    %c0_i32 = arith.constant 0 : i32
    %c0_i32_0 = arith.constant 0 : i32
    %c0_i32_1 = arith.constant 0 : i32
    return %arg0, %arg1, %c0_i32, %c0_i32_0 : i32, i32, i32, i32
  }
  func.func @transform_1(%arg0: i32, %arg1: i32) -> (i32, i32, i32) {
    %c0_i32 = arith.constant 0 : i32
    %c0_i32_0 = arith.constant 0 : i32
    %c0_i32_1 = arith.constant 0 : i32
    %c0_i32_2 = arith.constant 0 : i32
    return %c0_i32, %c0_i32_0, %c0_i32_1 : i32, i32, i32
  }
  func.func @transform_2(%arg0: i32, %arg1: i32) -> (i32, i32, i32) {
    %c0_i32 = arith.constant 0 : i32
    %c0_i32_0 = arith.constant 0 : i32
    %c0_i32_1 = arith.constant 0 : i32
    return %arg0, %c0_i32, %c0_i32_0 : i32, i32, i32
  }
  func.func @transform_3(%arg0: i32, %arg1: i32) -> (i32, i32, i32) {
    %c0_i32 = arith.constant 0 : i32
    %c0_i32_0 = arith.constant 0 : i32
    %c0_i32_1 = arith.constant 0 : i32
    return %arg0, %c0_i32, %c0_i32_0 : i32, i32, i32
  }
  func.func @transform_4(%arg0: i32, %arg1: i32) -> (i32, i32, i32, i32) {
    %c0_i32 = arith.constant 0 : i32
    %c0_i32_0 = arith.constant 0 : i32
    %c0_i32_1 = arith.constant 0 : i32
    return %arg0, %arg1, %c0_i32, %c0_i32_0 : i32, i32, i32, i32
  }
  func.func @transform_5(%arg0: i32, %arg1: i32) -> (i32, i32) {
    %c0_i32 = arith.constant 0 : i32
    %c0_i32_0 = arith.constant 0 : i32
    %c0_i32_1 = arith.constant 0 : i32
    return %c0_i32, %c0_i32_0 : i32, i32
  }
  func.func @transform_6(%arg0: i32, %arg1: i32) -> (i32, i32) {
    %c0_i32 = arith.constant 0 : i32
    %c0_i32_0 = arith.constant 0 : i32
    %c0_i32_1 = arith.constant 0 : i32
    return %c0_i32, %c0_i32_0 : i32, i32
  }
  func.func @transform_7(%arg0: i32, %arg1: i32) -> (i32, i32, i32, i32) {
    %c0_i32 = arith.constant 0 : i32
    %c0_i32_0 = arith.constant 0 : i32
    %c0_i32_1 = arith.constant 0 : i32
    return %arg0, %arg1, %c0_i32, %c0_i32_0 : i32, i32, i32, i32
  }
}

module attributes {stable_mosaic.version = 11 : i64} {
  func.func @_modconv_kernel(%arg0: i32, %arg1: i32, %arg2: memref<1x1x16x128xbf16, #tpu.memory_space<vmem>>, %arg3: memref<1x8x16xbf16, #tpu.memory_space<vmem>>, %arg4: memref<1x16x1xbf16, #tpu.memory_space<vmem>>, %arg5: memref<1x1x8x128xf32, #tpu.memory_space<vmem>>, %arg6: memref<1x1x8x128xf32, #tpu.memory_space<vmem>>, %arg7: memref<16x128xbf16, #tpu.memory_space<vmem>>) attributes {dimension_semantics = [#tpu.dimension_semantics<parallel>, #tpu.dimension_semantics<parallel>], iteration_bounds = array<i64: 2, 2>, scalar_prefetch = 0 : i64, scratch_operands = 1 : i64, tpu.core_type = #tpu.core_type<tc>, window_params = [{transform_indices = @transform_0, window_bounds = array<i64: 1, 1, 16, 128>}, {pipeline_mode = #tpu.pipeline_mode<synchronous>, transform_indices = @transform_1, window_bounds = array<i64: 1, 8, 16>}, {transform_indices = @transform_2, window_bounds = array<i64: 1, 16, 1>}, {transform_indices = @transform_3, window_bounds = array<i64: 1, 1, 8, 128>}, {transform_indices = @transform_4, window_bounds = array<i64: 1, 1, 8, 128>}]} {
    %c0 = arith.constant 0 : index
    %c0_0 = arith.constant 0 : index
    %c0_1 = arith.constant 0 : index
    %c0_2 = arith.constant 0 : index
    %0 = vector.load %arg2[%c0, %c0_0, %c0_1, %c0_2] : memref<1x1x16x128xbf16, #tpu.memory_space<vmem>>, vector<1x1x16x128xbf16>
    %1 = vector.shape_cast %0 : vector<1x1x16x128xbf16> to vector<16x128xbf16>
    %c0_3 = arith.constant 0 : index
    %c0_4 = arith.constant 0 : index
    %c0_5 = arith.constant 0 : index
    %2 = vector.load %arg4[%c0_3, %c0_4, %c0_5] : memref<1x16x1xbf16, #tpu.memory_space<vmem>>, vector<1x16x1xbf16>
    %3 = vector.shape_cast %2 : vector<1x16x1xbf16> to vector<16x1xbf16>
    %4 = vector.broadcast %3 : vector<16x1xbf16> to vector<16x128xbf16>
    %5 = arith.mulf %1, %4 : vector<16x128xbf16>
    %c0_6 = arith.constant 0 : index
    %c0_7 = arith.constant 0 : index
    %6 = vector.load %arg7[%c0_6, %c0_7] : memref<16x128xbf16, #tpu.memory_space<vmem>>, vector<16x128xbf16>
    tpu.vector_store %arg7[%c0_6, %c0_7], %5 {strides = array<i32>} : memref<16x128xbf16, #tpu.memory_space<vmem>>, vector<16x128xbf16>,
    %c0_8 = arith.constant 0 : index
    %c0_9 = arith.constant 0 : index
    %c0_10 = arith.constant 0 : index
    %7 = vector.load %arg3[%c0_8, %c0_9, %c0_10] : memref<1x8x16xbf16, #tpu.memory_space<vmem>>, vector<1x8x16xbf16>
    %8 = vector.shape_cast %7 : vector<1x8x16xbf16> to vector<8x16xbf16>
    %c0_11 = arith.constant 0 : index
    %c0_12 = arith.constant 0 : index
    %9 = vector.load %arg7[%c0_11, %c0_12] : memref<16x128xbf16, #tpu.memory_space<vmem>>, vector<16x128xbf16>
    %cst = arith.constant dense<0.000000e+00> : vector<8x128xf32>
    %10 = tpu.matmul %8, %9, %cst {dimension_numbers = #tpu.dot_dimension_numbers<[1], [0], [0], [1], [0, 0, 1, 1], [], []>} : vector<8x16xbf16>, vector<16x128xbf16>, vector<8x128xf32> -> vector<8x128xf32>
    %c0_13 = arith.constant 0 : index
    %c0_14 = arith.constant 0 : index
    %c0_15 = arith.constant 0 : index
    %c0_16 = arith.constant 0 : index
    %11 = vector.load %arg5[%c0_13, %c0_14, %c0_15, %c0_16] : memref<1x1x8x128xf32, #tpu.memory_space<vmem>>, vector<1x1x8x128xf32>
    %12 = vector.shape_cast %11 : vector<1x1x8x128xf32> to vector<8x128xf32>
    %13 = arith.addf %10, %12 : vector<8x128xf32>
    %c0_17 = arith.constant 0 : index
    %c0_18 = arith.constant 0 : index
    %c0_19 = arith.constant 0 : index
    %c0_20 = arith.constant 0 : index
    %14 = vector.load %arg6[%c0_17, %c0_18, %c0_19, %c0_20] : memref<1x1x8x128xf32, #tpu.memory_space<vmem>>, vector<1x1x8x128xf32>
    %15 = vector.shape_cast %14 : vector<1x1x8x128xf32> to vector<8x128xf32>
    %16 = vector.shape_cast %13 : vector<8x128xf32> to vector<1x1x8x128xf32>
    tpu.vector_store %arg6[%c0_17, %c0_18, %c0_19, %c0_20], %16 {strides = array<i32>} : memref<1x1x8x128xf32, #tpu.memory_space<vmem>>, vector<1x1x8x128xf32>,
    return
  }
  func.func @transform_0(%arg0: i32, %arg1: i32) -> (i32, i32, i32, i32) {
    %c0_i32 = arith.constant 0 : i32
    %c0_i32_0 = arith.constant 0 : i32
    %c0_i32_1 = arith.constant 0 : i32
    return %arg0, %arg1, %c0_i32, %c0_i32_0 : i32, i32, i32, i32
  }
  func.func @transform_1(%arg0: i32, %arg1: i32) -> (i32, i32, i32) {
    %c0_i32 = arith.constant 0 : i32
    %c0_i32_0 = arith.constant 0 : i32
    %c0_i32_1 = arith.constant 0 : i32
    %c0_i32_2 = arith.constant 0 : i32
    return %c0_i32, %c0_i32_0, %c0_i32_1 : i32, i32, i32
  }
  func.func @transform_2(%arg0: i32, %arg1: i32) -> (i32, i32, i32) {
    %c0_i32 = arith.constant 0 : i32
    %c0_i32_0 = arith.constant 0 : i32
    %c0_i32_1 = arith.constant 0 : i32
    return %arg0, %c0_i32, %c0_i32_0 : i32, i32, i32
  }
  func.func @transform_3(%arg0: i32, %arg1: i32) -> (i32, i32, i32, i32) {
    %c0_i32 = arith.constant 0 : i32
    %c0_i32_0 = arith.constant 0 : i32
    %c0_i32_1 = arith.constant 0 : i32
    return %arg0, %arg1, %c0_i32, %c0_i32_0 : i32, i32, i32, i32
  }
  func.func @transform_4(%arg0: i32, %arg1: i32) -> (i32, i32, i32, i32) {
    %c0_i32 = arith.constant 0 : i32
    %c0_i32_0 = arith.constant 0 : i32
    %c0_i32_1 = arith.constant 0 : i32
    return %arg0, %arg1, %c0_i32, %c0_i32_0 : i32, i32, i32, i32
  }
}

</mosaic_0001>

<bundles_post_ra>
// kernel: generator_block_forward.3
= control target key start
LH: loop header
LB: loop body
LE: loop exit
PB: predicated region body
PF: predicated region fallthrough
CT: control target
= control target key end

     0   :  { %s1355_s24 = smov 0   ;;  %s1357_s25 = smov 0   ;;  %s1518_s0 = inlined_call_operand.vmem [shape: bf16[2,2,16,384], index: 0, kind: input, shape index: {}]   ;;  %s1519_s1 = inlined_call_operand.vmem [shape: bf16[9,8,16], index: 1, kind: input, shape index: {}]   ;;  %s1520_s2 = inlined_call_operand.vmem [shape: bf16[2,16,1], index: 2, kind: input, shape index: {}]   ;;  %s1521_s3 = inlined_call_operand.vmem [shape: f32[2,8,1], index: 3, kind: input, shape index: {}]   ;;  %s1522_s4 = inlined_call_operand.vmem [shape: f32[2,2,1,256], index: 4, kind: input, shape index: {}]   ;;  %s1523_s5 = inlined_call_operand.vmem [shape: f32[8,1], index: 5, kind: input, shape index: {}]   ;;  %s1524_s6 = inlined_call_operand.vmem [shape: f32[8,1], index: 6, kind: input, shape index: {}]   ;;  %s1525_s7 = inlined_call_operand.vmem [shape: f32[2,2,8,256], index: 7, kind: output, shape index: {}]  }
   0x1   :  { %s1359_s26 = smov 0   ;;  %s1361_s27 = smov 0  }
   0x2   :  { %s1363_s28 = smov 0  }
   0x3 LB: > { %s26_s29 = sadd.s32 1, %s1295_s26  ;;  %s29_s30 = sadd.s32 1, %s1299_s27  ;;  %s1303_s28 = sphi %s1363_s28, %s17_s28   ;;  %s1299_s27 = sphi %s1361_s27, %s1529_s27   ;;  %s1295_s26 = sphi %s1359_s26, %s1528_s26   ;;  %s1291_s25 = sphi %s1357_s25, %s1527_s25   ;;  %s1287_s24 = sphi %s1355_s24, %s1526_s24  }
   0x4   : > { %p27_p0 = scmp.ge.s32.totalorder %s26_s29, 2  ;;  %p1148_p1 = scmp.ge.s32.totalorder %s1303_s28, 1 }
   0x5   : > { %p291_p2 = scmp.lt.s32.totalorder %s1303_s28, 5 }
   0x6   : > { %s1531_s29 = smov (%p27_p0, %s26_s29), 0  ;;  %s1533_s30 = smov (!%p27_p0, %s29_s30), %s1299_s27 }
   0x7   : > { %p292_p3 = pnand %p1148_p1, %p291_p2  ;;  %p31_p4 = scmp.ge.s32.totalorder %s1533_s30, 2 }
   0x8   : > { %p348_p5 = scmp.lt.s32.totalorder (!%p292_p3), %s1291_s25, 1  ;;  %v1305_v0 = vmov (!%p292_p3), 0   ;;  %p350_p6 = scmp.lt.s32.totalorder (!%p292_p3), %s1287_s24, 1  ;;  %v1306_v3 = vmov (!%p292_p3), 839922192   ;;  %v398_v5 = vlaneseq (!%p292_p3)  ;;  %v970_v24 = vld [vmem:[%s1523_s5] sm:$0xff] (!%p292_p3) }
   0x9   : > { %s1535_s30 = smov (%p31_p4, %s1533_s30), 0  ;;  %295 = sbr.rel (%p292_p3) target bundleno = 553 (0x229), region = 48 }
   0xa   : > { %1263 = vset.pattern.permute.xlu0 (!%p292_p3), %v1305_v0  ;;  %714 = vmatprep.mubr.bf16.mxu0 (!%p292_p3), %v1305_v0  ;;  %v396_v4 = vunpack.c.l.s4 (!%p292_p3), %v1306_v3  ;;  %v1405_v7 = vshrl.u32 (!%p292_p3), %v398_v5, 7  ;;  %s1307_s19 = smov (!%p292_p3), 109   ;;  %s1308_s20 = smov (!%p292_p3), 127   ;;  %v989_v25 = vld [vmem:[%s1524_s6] sm:$0xff] (!%p292_p3)  ;;  %vm674_vm0 = vcmask (!%p292_p3), 891904   ;;  %vm454_vm1 = vcmask (!%p292_p3), 1039360  }
   0xb   : > { %495 = vmatprep.mubr.bf16.mxu1 (!%p292_p3), %v1305_v0  ;;  %1264 = vset.pattern.permute.xlu1 (!%p292_p3), %v1305_v0  ;;  %s1309_s21 = smov (!%p292_p3), 108   ;;  %s1310_s22 = smov (!%p292_p3), 92   ;;  %vm459_vm2 = vcmask (!%p292_p3), 130048   ;;  %v1168_v33 = vld [vmem:[%s1519_s1 + $0x10] sm:$0xf] (!%p292_p3)  ;;  %vm733_vm3 = vcmask (!%p292_p3), 883712  }
   0xc   : > { %v397_v6 = vunpack.c.0.s8 (!%p292_p3), %v396_v4  ;;  %s1311_s23 = smov (!%p292_p3), 126   ;;  %s1312_s9 = smov (!%p292_p3), 91   ;;  %v1161_v44 = vld [vmem:[%s1519_s1 + $0x4] sm:$0xf] (!%p292_p3)  ;;  %vm792_vm4 = vcmask (!%p292_p3), 752640   ;;  %vm556_vm5 = vcmask (!%p292_p3), 1031168  }
   0xd   : > { %s1313_s10 = smov (!%p292_p3), 110   ;;  %v1170_v45 = vld [vmem:[%s1519_s1 + $0x14] sm:$0xf] (!%p292_p3)  ;;  %v437_v55 = vld [vmem:[%s1519_s1] sm:$0xf] (!%p292_p3)  ;;  %vm851_vm6 = vcmask (!%p292_p3), 744448  }
   0xe   : > { %v400_v8 = vsub.s32 (!%p292_p3), %v397_v6, %v1405_v7  ;;  %v1172_v56 = vld [vmem:[%s1519_s1 + $0x18] sm:$0xf] (!%p292_p3)  ;;  %vm615_vm7 = vcmask (!%p292_p3), 900096   ;;  %v1164_v4 = vld [vmem:[%s1519_s1 + $0x8] sm:$0xf] (!%p292_p3)  ;;  %vm910_vm8 = vcmask (!%p292_p3), 736256  }
   0xf   : > { %v1174_v5 = vld [vmem:[%s1519_s1 + $0x1c] sm:$0xf] (!%p292_p3) }
  0x10   : > { %s1537_s25 = smov (!%p348_p5, %s1291_s25), 1  ;;  %s1539_s24 = smov (!%p350_p6, %s1287_s24), 1 }
  0x11   : > { %s1180_s8 = sshll.u32 %s1537_s25, 3  ;;  %s1212_s12 = smul.u32 12, %s1537_s25 }
  0x12   : > { %s361_s11 = scalar_lea.vmem %s1520_s2, %s1180_s8  ;;  %s1211_s13 = smul.u32 6, %s1539_s24 }
  0x13   : > { %v388_v1 = vld [vmem:[%s361_s11] sm:$0xf]  ;;  %v389_v2 = vld [vmem:[%s361_s11 + $0x4] sm:$0xf]  ;;  %s1314_s11 = smov 90  }
  0x14   : > { %392 = vperm.xlu0 %1263, %v388_v1   ;;  %s354_s14 = sadd.s32 %s1212_s12, %s1211_s13 }
  0x15   : > { %s1149_s15 = sshll.u32 %s354_s14, 2 }
  0x16   : > { %s356_s18 = scalar_lea.vmem %s1518_s0, %s1149_s15 }
  0x17   : > { %v384_v11 = vld [vmem:[%s356_s18] sm:$0xff]  ;;  %v386_v13 = vld [vmem:[%s356_s18 + $0xc] sm:$0xff]  ;;  %v387_v15 = vld [vmem:[%s356_s18 + $0x14] sm:$0xf] }
  0x18   : > { %404 = vperm.xlu0 %1263, %v389_v2   ;;  %v385_v18 = vld [vmem:[%s356_s18 + $0x8] sm:$0xf]  ;;  %s365_s18 = scalar_lea.vmem %s1521_s3, %s1180_s8  ;;  %s1153_s8 = sshll.u32 %s1539_s24, 1 }
  0x19   : > { %v961_v26 = vld [vmem:[%s365_s18] sm:$0xff] }
  0x93   : > { %v393_v9 = vpop.permute.xlu0 %392 }
  0x94   : > { %v401_v10 = vrot.slane %v393_v9, %v400_v8 }
  0x96   : > { %v414_v16 = vmul.bf16 %v401_v10, %v384_v11  ;;  %v415_v22 = vmul.bf16 %v401_v10, %v385_v18 }
  0x97   : > { %v405_v12 = vpop.permute.xlu0 %404 }
  0x98   : > { %v413_v14 = vrot.slane %v405_v12, %v400_v8  ;;  %v1166_v12 = vld [vmem:[%s1519_s1 + $0xc] sm:$0xf] }
  0x9a   : > { %v416_v17 = vmul.bf16 %v413_v14, %v386_v13  ;;  %v417_v19 = vmul.bf16 %v413_v14, %v387_v15  ;;  %v1176_v13 = vld [vmem:[%s1519_s1 + $0x20] sm:$0xf]  ;;  %v974_v14 = vsub.s32 0, %v1405_v7 }
  0x9c   : > { %v1411_v20 = vcombine.low %v414_v16, %v416_v17  ;;  %v1413_v21 = vcombine.high %v414_v16, %v416_v17  ;;  %v1160_v23 = vcombine.low %v415_v22, %v417_v19  ;;  %v978_v16 = vsub.s32 1, %v1405_v7 }
  0x9e   : > { %670 = vrot.lane.b32.xlu1 %v1413_v21, %s1307_s19  ;;  %668 = vrot.lane.b32.xlu0 %v1411_v20, %s1307_s19 }
  0xa2   : > { %672 = vrot.lane.b32.xlu1 %v1160_v23, %s1307_s19  ;;  %452 = vrot.lane.b32.xlu0 %v1160_v23, %s1308_s20 }
  0xa6   : > { %450 = vrot.lane.b32.xlu1 %v1413_v21, %s1308_s20  ;;  %731 = vrot.lane.b32.xlu0 %v1160_v23, %s1309_s21 }
  0xaa   : > { %729 = vrot.lane.b32.xlu1 %v1413_v21, %s1309_s21  ;;  %727 = vrot.lane.b32.xlu0 %v1411_v20, %s1309_s21  ;;  %s1154_s21 = sshll.u32 %s1537_s25, 2 }
  0xae   : > { %448 = vrot.lane.b32.xlu1 %v1411_v20, %s1308_s20  ;;  %790 = vrot.lane.b32.xlu0 %v1160_v23, %s1310_s22 }
  0xb2   : > { %788 = vrot.lane.b32.xlu1 %v1413_v21, %s1310_s22  ;;  %552 = vrot.lane.b32.xlu0 %v1413_v21, %s1311_s23 }
  0xb6   : > { %786 = vrot.lane.b32.xlu1 %v1411_v20, %s1310_s22  ;;  %847 = vrot.lane.b32.xlu0 %v1413_v21, %s1312_s9  ;;  %s1491_s22 = sadd.s32 %s1154_s21, %s1153_s8 }
  0xb7   : > { %s1157_s24 = sshll.u32 %s1491_s22, 3 }
  0xb8   : > { %s382_s12 = scalar_lea.vmem %s1525_s7, %s1157_s24 }
  0xba   : > { %554 = vrot.lane.b32.xlu1 %v1160_v23, %s1311_s23  ;;  %550 = vrot.lane.b32.xlu0 %v1411_v20, %s1311_s23 }
  0xbe   : > { %849 = vrot.lane.b32.xlu1 %v1160_v23, %s1312_s9  ;;  %611 = vrot.lane.b32.xlu0 %v1413_v21, %s1313_s10 }
  0xc2   : > { %845 = vrot.lane.b32.xlu1 %v1411_v20, %s1312_s9  ;;  %906 = vrot.lane.b32.xlu0 %v1413_v21, %s1314_s11 }
  0xc6   : > { %613 = vrot.lane.b32.xlu1 %v1160_v23, %s1313_s10  ;;  %609 = vrot.lane.b32.xlu0 %v1411_v20, %s1313_s10  ;;  %s373_s10 = scalar_lea.vmem %s1522_s4, %s1491_s22 }
  0xc7   : > { %v969_v15 = vld [vmem:[%s373_s10] sm:$0x3] }
  0xc8   : > { %v975_v17 = vrot.slane %v969_v15, %v974_v14  ;;  %v979_v18 = vrot.slane %v969_v15, %v978_v16 }
  0xca   : > { %908 = vrot.lane.b32.xlu1 %v1160_v23, %s1314_s11  ;;  %984 = vperm.xlu0 %1263, %v970_v24  }
  0xce   : > { %904 = vrot.lane.b32.xlu1 %v1411_v20, %s1314_s11  ;;  %992 = vperm.xlu0 %1263, %v989_v25  }
  0xd2   : > { %964 = vperm.xlu1 %1264, %v961_v26  }
 0x110   : > { %v671_v27 = vpop.permute.xlu1 %670  ;;  %v669_v28 = vpop.permute.xlu0 %668 }
 0x111   : > { %v675_v32 = vsel %vm674_vm0, %v669_v28, %v671_v27 }
 0x114   : > { %v673_v29 = vpop.permute.xlu1 %672  ;;  %v453_v30 = vpop.permute.xlu0 %452 }
 0x115   : > { %v676_v31 = vsel %vm674_vm0, %v671_v27, %v673_v29 }
 0x116   : > { %682 = vmatprep.subr.bf16.mxu0 %v676_v31 }
 0x117   : > { %683 = vmatpush1.bf16.msra.mxu0 %v675_v32 }
 0x118   : > { %v451_v34 = vpop.permute.xlu1 %450  ;;  %v732_v35 = vpop.permute.xlu0 %731 }
 0x119   : > { %v456_v36 = vsel %vm454_vm1, %v451_v34, %v453_v30 }
 0x11a   : > { %463 = vmatprep.subr.bf16.mxu1 %v456_v36  ;;  %1169 = vmatmul.mubr.msk.bf16.vlgmr.msra.gmra.mrb[0].mxu0 %vm459_vm2, %v1168_v33 }
 0x11b   : > { %773 = vmatprep.mubr.bf16.mxu0 %v1305_v0 }
 0x11c   : > { %v730_v37 = vpop.permute.xlu1 %729  ;;  %v728_v38 = vpop.permute.xlu0 %727 }
 0x11d   : > { %v734_v39 = vsel %vm733_vm3, %v728_v38, %v730_v37  ;;  %v735_v40 = vsel %vm733_vm3, %v730_v37, %v732_v35 }
 0x11e   : > { %741 = vmatprep.subr.bf16.mxu0 %v735_v40 }
 0x11f   : > { %742 = vmatpush1.bf16.msra.mxu0 %v734_v39 }
 0x120   : > { %v449_v41 = vpop.permute.xlu1 %448  ;;  %v791_v42 = vpop.permute.xlu0 %790 }
 0x121   : > { %v455_v43 = vsel %vm454_vm1, %v449_v41, %v451_v34 }
 0x122   : > { %464 = vmatpush1.bf16.msra.mxu1 %v455_v43 }
 0x123   : > { %507 = vmatprep.subr.bf16.mxu1 %v1413_v21 }
 0x124   : > { %v789_v46 = vpop.permute.xlu1 %788  ;;  %v553_v47 = vpop.permute.xlu0 %552 }
 0x125   : > { %1162 = vmatmul.mubr.msk.bf16.vlgmr.msra.gmra.mrb[0].mxu1 %vm459_vm2, %v1161_v44  ;;  %v794_v48 = vsel %vm792_vm4, %v789_v46, %v791_v42 }
 0x126   : > { %508 = vmatpush1.bf16.msra.mxu1 %v1411_v20  ;;  %1171 = vmatmul.mubr.msk.bf16.vlgmr.msra.gmra.mrb[0].mxu0 %vm459_vm2, %v1170_v45 }
 0x127   : > { %800 = vmatprep.subr.bf16.mxu0 %v794_v48  ;;  %539 = vmatprep.mubr.bf16.mxu1 %v1305_v0 }
 0x128   : > { %v787_v49 = vpop.permute.xlu1 %786  ;;  %v848_v50 = vpop.permute.xlu0 %847  ;;  %832 = vmatprep.mubr.bf16.mxu0 %v1305_v0 }
 0x129   : > { %v793_v51 = vsel %vm792_vm4, %v787_v49, %v789_v46 }
 0x12a   : > { %801 = vmatpush1.bf16.msra.mxu0 %v793_v51 }
 0x12c   : > { %v555_v52 = vpop.permute.xlu1 %554  ;;  %v551_v53 = vpop.permute.xlu0 %550 }
 0x12d   : > { %v558_v54 = vsel %vm556_vm5, %v553_v47, %v555_v52  ;;  %v557_v59 = vsel %vm556_vm5, %v551_v53, %v553_v47 }
 0x12e   : > { %564 = vmatprep.subr.bf16.mxu1 %v558_v54 }
 0x130   : > { %v850_v57 = vpop.permute.xlu1 %849  ;;  %v612_v58 = vpop.permute.xlu0 %611 }
 0x131   : > { %1163 = vmatmul.mubr.msk.bf16.vlgmr.msra.gmra.mrb[0].mxu1 %vm459_vm2, %v437_v55  ;;  %v853_v60 = vsel %vm851_vm6, %v848_v50, %v850_v57 }
 0x132   : > { %565 = vmatpush1.bf16.msra.mxu1 %v557_v59  ;;  %1173 = vmatmul.mubr.msk.bf16.vlgmr.msra.gmra.mrb[0].mxu0 %vm459_vm2, %v1172_v56 }
 0x133   : > { %859 = vmatprep.subr.bf16.mxu0 %v853_v60  ;;  %596 = vmatprep.mubr.bf16.mxu1 %v1305_v0 }
 0x134   : > { %v846_v61 = vpop.permute.xlu1 %845  ;;  %v907_v62 = vpop.permute.xlu0 %906  ;;  %891 = vmatprep.mubr.bf16.mxu0 %v1305_v0 }
 0x135   : > { %v852_v63 = vsel %vm851_vm6, %v846_v61, %v848_v50 }
 0x136   : > { %860 = vmatpush1.bf16.msra.mxu0 %v852_v63 }
 0x138   : > { %v614_v1 = vpop.permute.xlu1 %613  ;;  %v610_v3 = vpop.permute.xlu0 %609 }
 0x139   : > { %v617_v2 = vsel %vm615_vm7, %v612_v58, %v614_v1  ;;  %v616_v8 = vsel %vm615_vm7, %v610_v3, %v612_v58 }
 0x13a   : > { %623 = vmatprep.subr.bf16.mxu1 %v617_v2 }
 0x13c   : > { %v909_v6 = vpop.permute.xlu1 %908 }
 0x13d   : > { %1165 = vmatmul.mubr.msk.bf16.vlgmr.msra.gmra.mrb[0].mxu1 %vm459_vm2, %v1164_v4  ;;  %v912_v9 = vsel %vm910_vm8, %v907_v62, %v909_v6 }
 0x13e   : > { %624 = vmatpush1.bf16.msra.mxu1 %v616_v8  ;;  %1175 = vmatmul.mubr.msk.bf16.vlgmr.msra.gmra.mrb[0].mxu0 %vm459_vm2, %v1174_v5 }
 0x13f   : > { %918 = vmatprep.subr.bf16.mxu0 %v912_v9  ;;  %655 = vmatprep.mubr.bf16.mxu1 %v1305_v0 }
 0x140   : > { %v905_v10 = vpop.permute.xlu1 %904  ;;  %950 = vmatprep.mubr.bf16.mxu0 %v1305_v0 }
 0x141   : > { %v911_v11 = vsel %vm910_vm8, %v905_v10, %v907_v62 }
 0x142   : > { %919 = vmatpush1.bf16.msra.mxu0 %v911_v11 }
 0x149   : > { %1167 = vmatmul.mubr.msk.bf16.vlgmr.msra.gmra.mrb[0].mxu1 %vm459_vm2, %v1166_v12  ;;  %v985_v0 = vpop.permute.xlu0 %984 }
 0x14a   : > { %1177 = vmatmul.mubr.msk.bf16.vlgmr.msra.gmra.mrb[0].mxu0 %vm459_vm2, %v1176_v13  ;;  %v987_v24 = vmul.f32 %v985_v0, %v975_v17  ;;  %v988_v28 = vmul.f32 %v985_v0, %v979_v18 }
 0x14d   : > { %v993_v19 = vpop.permute.xlu0 %992 }
 0x14e   : > { %v995_v32 = vadd.f32 %v993_v19, %v987_v24  ;;  %v996_v7 = vadd.f32 %v993_v19, %v988_v28 }
 0x151   : > { %v965_v21 = vpop.permute.xlu1 %964 }
 0x21c   : > { %v657_v20 = vpop.f32.mrb[0].mxu1 }
 0x21d   : > { %v659_v22 = vpop.f32.mrb[1].mxu1  ;;  %v952_v23 = vpop.f32.mrb[0].mxu0 }
 0x21e   : > { %v1181_v25 = vadd.f32 %v952_v23, %v657_v20  ;;  %v661_v26 = vpop.f32.mrb[2].mxu1  ;;  %v954_v27 = vpop.f32.mrb[1].mxu0 }
 0x21f   : > { %v1182_v29 = vadd.f32 %v954_v27, %v659_v22  ;;  %v662_v30 = vpop.f32.mrb[3].mxu1  ;;  %v956_v31 = vpop.f32.mrb[2].mxu0 }
 0x220   : > { %v967_v33 = vmul.f32 %v1181_v25, %v965_v21  ;;  %v957_v34 = vpop.f32.mrb[3].mxu0 }
 0x221   : > { %v968_v35 = vmul.f32 %v1182_v29, %v965_v21 }
 0x222   : > { %v997_v36 = vadd.f32 %v995_v32, %v967_v33 }
 0x223   : > { %v998_v37 = vadd.f32 %v996_v7, %v968_v35 }
 0x224   : > { %vm999_vm9 = vcmp.ge.f32.partialorder %v997_v36, 0.0  ;;  %v1001_v38 = vmul.f32 0.2, %v997_v36 }
 0x225   : > { %vm1000_vm10 = vcmp.ge.f32.partialorder %v998_v37, 0.0  ;;  %v1002_v39 = vmul.f32 0.2, %v998_v37 }
 0x226   : > { %v1003_v40 = vsel %vm999_vm9, %v997_v36, %v1001_v38 }
 0x227   : > { %v1004_v41 = vsel %vm1000_vm10, %v998_v37, %v1002_v39  ;;  %1005 = vst [vmem:[%s382_s12] sm:$0xff] %v1003_v40 }
 0x228   : > { %1006 = vst [vmem:[%s382_s12 + $0x8] sm:$0xff] %v1004_v41 }
 0x229 PF: > { %s17_s28 = sadd.s32 1, %s1303_s28   ;;  %s1526_s24 = smov %s1295_s26 }
 0x22a   : > { %p14_p7 = scmp.ge.s32.totalorder %s17_s28, 6   ;;  %s1527_s25 = smov %s1299_s27 }
 0x22b   : > { %s1528_s26 = smov %s1531_s29  ;;  %s1529_s27 = smov %s1535_s30 }
 0x22c   :  { %16 = sbr.rel (!%p14_p7) target bundleno = 3 (0x3), region = 95 }

// kernel: generator_block_forward.5
= control target key start
LH: loop header
LB: loop body
LE: loop exit
PB: predicated region body
PF: predicated region fallthrough
CT: control target
= control target key end

     0   :  { %s629_s15 = smov 0   ;;  %s631_s16 = smov 0   ;;  %s696_s0 = inlined_call_operand.vmem [shape: bf16[2,2,16,128], index: 0, kind: input, shape index: {}]   ;;  %s697_s1 = inlined_call_operand.vmem [shape: bf16[1,8,16], index: 1, kind: input, shape index: {}]   ;;  %s698_s2 = inlined_call_operand.vmem [shape: bf16[2,16,1], index: 2, kind: input, shape index: {}]   ;;  %s699_s3 = inlined_call_operand.vmem [shape: f32[2,2,8,128], index: 3, kind: input, shape index: {}]   ;;  %s700_s4 = inlined_call_operand.vmem [shape: f32[2,2,8,128], index: 4, kind: output, shape index: {}]  }
   0x1   :  { %s633_s17 = smov 0   ;;  %s635_s18 = smov 0  }
   0x2   :  { %s637_s19 = smov 0  }
   0x3 LB: > { %s23_s20 = sadd.s32 1, %s590_s17  ;;  %s26_s21 = sadd.s32 1, %s594_s18  ;;  %s598_s19 = sphi %s637_s19, %s14_s19   ;;  %s594_s18 = sphi %s635_s18, %s704_s18   ;;  %s590_s17 = sphi %s633_s17, %s703_s17   ;;  %s586_s16 = sphi %s631_s16, %s702_s16   ;;  %s582_s15 = sphi %s629_s15, %s701_s15  }
   0x4   : > { %p24_p0 = scmp.ge.s32.totalorder %s23_s20, 2  ;;  %p492_p1 = scmp.ge.s32.totalorder %s598_s19, 1 }
   0x5   : > { %p207_p2 = scmp.lt.s32.totalorder %s598_s19, 5 }
   0x6   : > { %s706_s20 = smov (%p24_p0, %s23_s20), 0  ;;  %s708_s21 = smov (!%p24_p0, %s26_s21), %s594_s18 }
   0x7   : > { %p208_p3 = pnand %p492_p1, %p207_p2  ;;  %p28_p4 = scmp.ge.s32.totalorder %s708_s21, 2 }
   0x8   : > { %p253_p5 = scmp.lt.s32.totalorder (!%p208_p3), %s586_s16, 1  ;;  %v600_v0 = vmov (!%p208_p3), 0   ;;  %v601_v3 = vmov (!%p208_p3), 0.0   ;;  %p255_p6 = scmp.lt.s32.totalorder (!%p208_p3), %s582_s15, 1  ;;  %vm602_vm0 = vmmov (!%p208_p3), 0   ;;  %v296_v6 = vlaneseq (!%p208_p3) }
   0x9   : > { %s710_s21 = smov (%p28_p4, %s708_s21), 0  ;;  %211 = sbr.rel (%p208_p3) target bundleno = 376 (0x178), region = 36 }
   0xa   : > { %559 = vset.pattern.permute.xlu0 (!%p208_p3), %v600_v0  ;;  %509 = vmatprep.subr.bf16.mxu0 (!%p208_p3), %v601_v3  ;;  %v603_v4 = vmov (!%p208_p3), 839922192   ;;  %v297_v8 = vshrl.u32 (!%p208_p3), %v296_v6, 7  ;;  %v321_v19 = vld [vmem:[%s697_s1] sm:$0xf] (!%p208_p3)  ;;  %vm324_vm1 = vcmask (!%p208_p3), 130048  }
   0xb   : > { %511 = vmatprep.mubr.msk.bf16.mxu0 (!%p208_p3), %vm602_vm0, %v601_v3  ;;  %v294_v5 = vunpack.c.l.s4 (!%p208_p3), %v603_v4 }
   0xd   : > { %v295_v7 = vunpack.c.0.s8 (!%p208_p3), %v294_v5 }
   0xf   : > { %v298_v9 = vsub.s32 (!%p208_p3), %v295_v7, %v297_v8 }
  0x10   : > { %s712_s16 = smov (!%p253_p5, %s586_s16), 1  ;;  %s714_s15 = smov (!%p255_p6, %s582_s15), 1 }
  0x11   : > { %s506_s22 = sshll.u32 %s712_s16, 3  ;;  %s498_s26 = sshll.u32 %s712_s16, 1 }
  0x12   : > { %s266_s25 = scalar_lea.vmem %s698_s2, %s506_s22  ;;  %s666_s27 = sadd.s32 %s498_s26, %s714_s15 }
  0x13   : > { %v286_v1 = vld [vmem:[%s266_s25] sm:$0xf]  ;;  %v287_v2 = vld [vmem:[%s266_s25 + $0x4] sm:$0xf]  ;;  %s493_s28 = sshll.u32 %s714_s15, 1  ;;  %s494_s29 = sshll.u32 %s712_s16, 2 }
  0x14   : > { %290 = vperm.xlu0 %559, %v286_v1   ;;  %s259_s30 = sadd.s32 %s494_s29, %s493_s28  ;;  %s499_s11 = sshll.u32 %s666_s27, 3 }
  0x15   : > { %s495_s5 = sshll.u32 %s259_s30, 2  ;;  %s274_s14 = scalar_lea.vmem %s699_s3, %s499_s11 }
  0x16   : > { %s261_s8 = scalar_lea.vmem %s696_s0, %s495_s5  ;;  %v323_v20 = vld [vmem:[%s274_s14] sm:$0xff]  ;;  %s282_s22 = scalar_lea.vmem %s700_s4, %s499_s11 }
  0x17   : > { %v284_v12 = vld [vmem:[%s261_s8] sm:$0xf]  ;;  %v285_v14 = vld [vmem:[%s261_s8 + $0x4] sm:$0xf] }
  0x18   : > { %302 = vperm.xlu0 %559, %v287_v2  }
  0x93   : > { %v291_v10 = vpop.permute.xlu0 %290 }
  0x94   : > { %v299_v11 = vrot.slane %v291_v10, %v298_v9 }
  0x96   : > { %v312_v16 = vmul.bf16 %v299_v11, %v284_v12 }
  0x97   : > { %v303_v13 = vpop.permute.xlu0 %302 }
  0x98   : > { %v311_v15 = vrot.slane %v303_v13, %v298_v9 }
  0x9a   : > { %v313_v17 = vmul.bf16 %v311_v15, %v285_v14 }
  0x9c   : > { %v502_v18 = vcombine.low %v312_v16, %v313_v17 }
  0x9e   : > { %510 = vmatpush3.bf16.msra.mxu0 %v502_v18 }
  0xa1   : > { %512 = vmatmul.mubr.msk.bf16.vlgmr.msra.gmra.mrb[0].mxu0 %vm324_vm1, %v321_v19 }
 0x174   : > { %v362_v21 = vpop.f32.mrb[0].mxu0 }
 0x175   : > { %v363_v22 = vadd.f32 %v362_v21, %v323_v20  ;;  %v513_v23 = vpop.f32.mrb[1].mxu0 }
 0x176   : > { %v365_v24 = vpop.f32.mrb[2].mxu0 }
 0x177   : > { %368 = vst [vmem:[%s282_s22] sm:$0xff] %v363_v22  ;;  %v514_v25 = vpop.f32.mrb[3].mxu0 }
 0x178 PF: > { %s14_s19 = sadd.s32 1, %s598_s19   ;;  %s701_s15 = smov %s590_s17 }
 0x179   : > { %p11_p7 = scmp.ge.s32.totalorder %s14_s19, 6   ;;  %s702_s16 = smov %s594_s18 }
 0x17a   : > { %s703_s17 = smov %s706_s20  ;;  %s704_s18 = smov %s710_s21 }
 0x17b   :  { %13 = sbr.rel (!%p11_p7) target bundleno = 3 (0x3), region = 72 }

</bundles_post_ra>
